<compile_context>
chip_gen: v7x
topology: tpu7x:2x2x1
jax: 0.10.0
libtpu: 0.0.40
codegen_flags: <defaults>
</compile_context>

<pallas_src>
import jax
import jax.numpy as jnp
from jax.experimental import pallas as pl
from jax.experimental.pallas import tpu as pltpu

# ---- small problem sizes consistent with the forward pass ----
B, C, T = 2, 4, 16          # batch, input channels, time steps
D1, D2 = 16, 16             # feature-extractor branch widths
D = D1 + D2                 # concatenated feature dim
H = 32                      # temporal-conv hidden width
NC = 8                      # output classes
M = 3                       # mask "channel" dim (only row 0 is used)
LP = 128                    # lane-dense padded width for the folded B*T axis
assert B * T <= LP

# ---- row layout of the single packed parameter slab (ROWS, LP) ----
R_WFE = 0                   # (D, C)   @ rows [0, 32),   cols [0, 4)
R_WTC = R_WFE + D           # (H, 3D)  @ rows [32, 64),  cols [0, 96)
R_WO = R_WTC + H            # (NC, H)  @ rows [64, 72),  cols [0, 32)
R_BFE = 72                  # (D, 1)   @ rows [72, 104)
R_BTC = R_BFE + D           # (H, 1)   @ rows [104, 136)
R_BO = R_BTC + H            # (NC, 1)  @ rows [136, 144)
R_PM = 144                  # (1, LP)  prev-tap boundary mask
R_NM = 152                  # (1, LP)  next-tap boundary mask
ROWS = 160                  # sublane-aligned total

FLOPS = 2 * LP * (D * C + H * 3 * D + NC * H)
BYTES = 4 * (C * LP + 1 * LP + ROWS * LP + NC * LP)


def surgery_kernel(x_ref, m_ref, p_ref, out_ref):
    x = x_ref[...]                                   # (C, LP)
    m = m_ref[...]                                   # (1, LP)

    # static slices into the packed slab; every row offset is a multiple of 8
    # and every column offset is 0, so these are cheap aligned loads.
    w_fe = p_ref[R_WFE:R_WFE + D, 0:C]               # (D, C)
    w_tc = p_ref[R_WTC:R_WTC + H, 0:3 * D]           # (H, 3D)
    w_o = p_ref[R_WO:R_WO + NC, 0:H]                 # (NC, H)
    b_fe = p_ref[R_BFE:R_BFE + D, 0:1]               # (D, 1)
    b_tc = p_ref[R_BTC:R_BTC + H, 0:1]               # (H, 1)
    b_o = p_ref[R_BO:R_BO + NC, 0:1]                 # (NC, 1)
    pm = p_ref[R_PM:R_PM + 1, :]                     # (1, LP)
    nm = p_ref[R_NM:R_NM + 1, :]                     # (1, LP)

    # --- feature extractor: both pointwise-conv branches in one MXU push ---
    feat = jnp.dot(w_fe, x, preferred_element_type=jnp.float32)
    feat = jnp.maximum(feat + b_fe, 0.0) * m         # (D, LP)

    # --- kernel=3 temporal conv taps via XLU rolls.  pltpu.roll needs a
    #     non-negative axis/shift, so "-1" is written as LP-1.  The
    #     precomputed boundary masks restore zero-padding semantics at each
    #     folded-batch edge (and across the lane padding). ---
    f_prev = pltpu.roll(feat, 1, axis=1) * pm        # f_prev[t] = feat[t-1]
    f_next = pltpu.roll(feat, LP - 1, axis=1) * nm   # f_next[t] = feat[t+1]

    # single fused matmul: [wc0|wc1|wc2] (H,3D) @ [f_prev; feat; f_next]
    stacked = jnp.concatenate([f_prev, feat, f_next], axis=0)   # (3D, LP)
    h = jnp.dot(w_tc, stacked, preferred_element_type=jnp.float32)
    h = jnp.maximum(h + b_tc, 0.0)                   # (H, LP)

    # --- classifier (1x1 conv) + output masking ---
    logits = jnp.dot(w_o, h, preferred_element_type=jnp.float32)
    out_ref[...] = (logits + b_o) * m                # (NC, LP)


def prepack_params(params):
    """One-time packing of all weights/biases/boundary masks into a single
    lane-dense (ROWS, 128) slab -> one parameter DMA per kernel call."""
    w_fe = jnp.concatenate([params["w1"], params["w2"]], axis=0)       # (D, C)
    b_fe = jnp.concatenate([params["b1"], params["b2"]], axis=0)       # (D, 1)
    w_tc = jnp.concatenate([params["wc0"], params["wc1"], params["wc2"]],
                           axis=1)                                     # (H, 3D)

    col = jnp.arange(LP)
    t_in = col % T
    pm = (t_in != 0).astype(jnp.float32)[None, :]       # valid prev tap
    nm = (t_in != T - 1).astype(jnp.float32)[None, :]   # valid next tap

    p = jnp.zeros((ROWS, LP), jnp.float32)
    p = p.at[R_WFE:R_WFE + D, 0:C].set(w_fe)
    p = p.at[R_WTC:R_WTC + H, 0:3 * D].set(w_tc)
    p = p.at[R_WO:R_WO + NC, 0:H].set(params["wo"])
    p = p.at[R_BFE:R_BFE + D, 0:1].set(b_fe)
    p = p.at[R_BTC:R_BTC + H, 0:1].set(params["bc"])
    p = p.at[R_BO:R_BO + NC, 0:1].set(params["bo"])
    p = p.at[R_PM:R_PM + 1, :].set(pm)
    p = p.at[R_NM:R_NM + 1, :].set(nm)
    return p


def surgery_forward(x, lengths, mask, packed):
    del lengths  # passed through the PyTorch forward but never used

    # glue: mask.permute(0, 2, 1)[:, 0, :].unsqueeze(1) -> keep row 0, (B, T)
    m_row = jnp.transpose(mask, (0, 2, 1))[:, 0, :].astype(jnp.float32)

    # fold batch into the lane axis and pad to a lane-dense width LP=128.
    # TODO(synk): at production T feed (B,C,T) directly via a BlockSpec
    # index_map (grid over batch/time) instead of this wrapper transpose+pad.
    x2d = jnp.transpose(x, (1, 0, 2)).reshape(C, B * T)        # (C, B*T)
    x2d = jnp.pad(x2d, ((0, 0), (0, LP - B * T)))
    m2d = jnp.pad(m_row.reshape(1, B * T), ((0, 0), (0, LP - B * T)))

    vmem = pl.BlockSpec(memory_space=pltpu.MemorySpace.VMEM)
    out2d = pl.pallas_call(
        surgery_kernel,
        out_shape=jax.ShapeDtypeStruct((NC, LP), jnp.float32),
        in_specs=[vmem, vmem, vmem],
        out_specs=vmem,
        cost_estimate=pl.CostEstimate(
            flops=FLOPS, transcendentals=0, bytes_accessed=BYTES),
    )(x2d, m2d, packed)

    # un-fold: (NC, LP) -> (NC, B*T) -> (B, NC, T)
    return out2d[:, :B * T].reshape(NC, B, T).transpose(1, 0, 2)


def reference_forward(x, lengths, mask, params):
    """Pure-JAX replica of the PyTorch semantics, for verification."""
    del lengths
    m = jnp.transpose(mask, (0, 2, 1))[:, 0:1, :].astype(jnp.float32)   # (B,1,T)
    f1 = jax.nn.relu(jnp.einsum('dc,bct->bdt', params["w1"], x) + params["b1"][None])
    f2 = jax.nn.relu(jnp.einsum('dc,bct->bdt', params["w2"], x) + params["b2"][None])
    feat = jnp.concatenate([f1, f2], axis=1) * m                         # (B,D,T)
    fp = jnp.pad(feat, ((0, 0), (0, 0), (1, 1)))
    h = (jnp.einsum('hd,bdt->bht', params["wc0"], fp[:, :, 0:T]) +
         jnp.einsum('hd,bdt->bht', params["wc1"], fp[:, :, 1:T + 1]) +
         jnp.einsum('hd,bdt->bht', params["wc2"], fp[:, :, 2:T + 2]) +
         params["bc"][None])
    h = jax.nn.relu(h)
    logits = jnp.einsum('nh,bht->bnt', params["wo"], h) + params["bo"][None]
    return logits * m


def init_params(key):
    ks = jax.random.split(key, 8)
    return {
        "w1": 0.2 * jax.random.normal(ks[0], (D1, C), jnp.float32),
        "b1": 0.1 * jax.random.normal(ks[1], (D1, 1), jnp.float32),
        "w2": 0.2 * jax.random.normal(ks[2], (D2, C), jnp.float32),
        "b2": 0.1 * jax.random.normal(ks[3], (D2, 1), jnp.float32),
        "wc0": 0.1 * jax.random.normal(ks[4], (H, D), jnp.float32),
        "wc1": 0.1 * jax.random.normal(ks[5], (H, D), jnp.float32),
        "wc2": 0.1 * jax.random.normal(ks[6], (H, D), jnp.float32),
        "bc": jnp.zeros((H, 1), jnp.float32),
        "wo": 0.1 * jax.random.normal(ks[7], (NC, H), jnp.float32),
        "bo": jnp.zeros((NC, 1), jnp.float32),
    }


if __name__ == "__main__":
    key = jax.random.PRNGKey(0)
    kx, _ = jax.random.split(key)

    x = jax.random.normal(kx, (B, C, T), jnp.float32)
    lengths = jnp.array([T, T - 4], jnp.int32)
    t_idx = jnp.arange(T)[None, :, None]                 # (1, T, 1)
    mask = (t_idx < lengths[:, None, None]).astype(jnp.float32)
    mask = jnp.broadcast_to(mask, (B, T, M))             # (B, T, M)

    params = init_params(jax.random.PRNGKey(42))
    packed = jax.block_until_ready(prepack_params(params))   # one-time prepack

    out = surgery_forward(x, lengths, mask, packed)
    out = jax.block_until_ready(out)

    ref = reference_forward(x, lengths, mask, params)
    assert out.shape == (B, NC, T)
    assert jnp.allclose(out, ref, rtol=1e-5, atol=1e-5), "mismatch vs reference"

    print("KERNEL_OK")
</pallas_src>

<mosaic_0001>
module attributes {stable_mosaic.version = 11 : i64} {
  func.func @surgery_kernel(%arg0: memref<4x128xf32, #tpu.memory_space<vmem>>, %arg1: memref<1x128xf32, #tpu.memory_space<vmem>>, %arg2: memref<160x128xf32, #tpu.memory_space<vmem>>, %arg3: memref<8x128xf32, #tpu.memory_space<vmem>>) attributes {dimension_semantics = [], scalar_prefetch = 0 : i64, scratch_operands = 0 : i64, tpu.core_type = #tpu.core_type<tc>} {
    %c0 = arith.constant 0 : index
    %c0_0 = arith.constant 0 : index
    %0 = vector.load %arg0[%c0, %c0_0] : memref<4x128xf32, #tpu.memory_space<vmem>>, vector<4x128xf32>
    %c0_1 = arith.constant 0 : index
    %c0_2 = arith.constant 0 : index
    %1 = vector.load %arg1[%c0_1, %c0_2] : memref<1x128xf32, #tpu.memory_space<vmem>>, vector<1x128xf32>
    %c0_3 = arith.constant 0 : index
    %c0_4 = arith.constant 0 : index
    %2 = vector.load %arg2[%c0_3, %c0_4] : memref<160x128xf32, #tpu.memory_space<vmem>>, vector<32x4xf32>
    %c32 = arith.constant 32 : index
    %c0_5 = arith.constant 0 : index
    %3 = vector.load %arg2[%c32, %c0_5] : memref<160x128xf32, #tpu.memory_space<vmem>>, vector<32x96xf32>
    %c64 = arith.constant 64 : index
    %c0_6 = arith.constant 0 : index
    %4 = vector.load %arg2[%c64, %c0_6] : memref<160x128xf32, #tpu.memory_space<vmem>>, vector<8x32xf32>
    %c72 = arith.constant 72 : index
    %c0_7 = arith.constant 0 : index
    %5 = vector.load %arg2[%c72, %c0_7] : memref<160x128xf32, #tpu.memory_space<vmem>>, vector<32x1xf32>
    %c104 = arith.constant 104 : index
    %c0_8 = arith.constant 0 : index
    %6 = vector.load %arg2[%c104, %c0_8] : memref<160x128xf32, #tpu.memory_space<vmem>>, vector<32x1xf32>
    %c136 = arith.constant 136 : index
    %c0_9 = arith.constant 0 : index
    %7 = vector.load %arg2[%c136, %c0_9] : memref<160x128xf32, #tpu.memory_space<vmem>>, vector<8x1xf32>
    %c144 = arith.constant 144 : index
    %c0_10 = arith.constant 0 : index
    %8 = vector.load %arg2[%c144, %c0_10] : memref<160x128xf32, #tpu.memory_space<vmem>>, vector<1x128xf32>
    %c152 = arith.constant 152 : index
    %c0_11 = arith.constant 0 : index
    %9 = vector.load %arg2[%c152, %c0_11] : memref<160x128xf32, #tpu.memory_space<vmem>>, vector<1x128xf32>
    %cst = arith.constant dense<0.000000e+00> : vector<32x128xf32>
    %10 = tpu.matmul %2, %0, %cst {dimension_numbers = #tpu.dot_dimension_numbers<[1], [0], [0], [1], [0, 0, 1, 1], [], []>} : vector<32x4xf32>, vector<4x128xf32>, vector<32x128xf32> -> vector<32x128xf32>
    %11 = vector.broadcast %5 : vector<32x1xf32> to vector<32x128xf32>
    %12 = arith.addf %10, %11 : vector<32x128xf32>
    %cst_12 = arith.constant 0.000000e+00 : f32
    %13 = vector.broadcast %cst_12 : f32 to vector<32x128xf32>
    %14 = arith.maximumf %12, %13 : vector<32x128xf32>
    %15 = vector.broadcast %1 : vector<1x128xf32> to vector<32x128xf32>
    %16 = arith.mulf %14, %15 : vector<32x128xf32>
    %c1_i32 = arith.constant 1 : i32
    %17 = tpu.dynamic_rotate %16 by %c1_i32 dim 1 : vector<32x128xf32>, i32 -> vector<32x128xf32>
    %18 = vector.broadcast %8 : vector<1x128xf32> to vector<32x128xf32>
    %19 = arith.mulf %17, %18 : vector<32x128xf32>
    %c127_i32 = arith.constant 127 : i32
    %20 = tpu.dynamic_rotate %16 by %c127_i32 dim 1 : vector<32x128xf32>, i32 -> vector<32x128xf32>
    %21 = vector.broadcast %9 : vector<1x128xf32> to vector<32x128xf32>
    %22 = arith.mulf %20, %21 : vector<32x128xf32>
    %23 = tpu.concatenate %19, %16, %22 in 0 : vector<32x128xf32>, vector<32x128xf32>, vector<32x128xf32> -> vector<96x128xf32>
    %cst_13 = arith.constant dense<0.000000e+00> : vector<32x128xf32>
    %24 = tpu.matmul %3, %23, %cst_13 {dimension_numbers = #tpu.dot_dimension_numbers<[1], [0], [0], [1], [0, 0, 1, 1], [], []>} : vector<32x96xf32>, vector<96x128xf32>, vector<32x128xf32> -> vector<32x128xf32>
    %25 = vector.broadcast %6 : vector<32x1xf32> to vector<32x128xf32>
    %26 = arith.addf %24, %25 : vector<32x128xf32>
    %cst_14 = arith.constant 0.000000e+00 : f32
    %27 = vector.broadcast %cst_14 : f32 to vector<32x128xf32>
    %28 = arith.maximumf %26, %27 : vector<32x128xf32>
    %cst_15 = arith.constant dense<0.000000e+00> : vector<8x128xf32>
    %29 = tpu.matmul %4, %28, %cst_15 {dimension_numbers = #tpu.dot_dimension_numbers<[1], [0], [0], [1], [0, 0, 1, 1], [], []>} : vector<8x32xf32>, vector<32x128xf32>, vector<8x128xf32> -> vector<8x128xf32>
    %30 = vector.broadcast %7 : vector<8x1xf32> to vector<8x128xf32>
    %31 = arith.addf %29, %30 : vector<8x128xf32>
    %32 = vector.broadcast %1 : vector<1x128xf32> to vector<8x128xf32>
    %33 = arith.mulf %31, %32 : vector<8x128xf32>
    %c0_16 = arith.constant 0 : index
    %c0_17 = arith.constant 0 : index
    %34 = vector.load %arg3[%c0_16, %c0_17] : memref<8x128xf32, #tpu.memory_space<vmem>>, vector<8x128xf32>
    tpu.vector_store %arg3[%c0_16, %c0_17], %33 {strides = array<i32>} : memref<8x128xf32, #tpu.memory_space<vmem>>, vector<8x128xf32>,
    return
  }
}

</mosaic_0001>

<bundles_post_ra>
// kernel: tpu_custom_call.1
= control target key start
LH: loop header
LB: loop body
LE: loop exit
PB: predicated region body
PF: predicated region fallthrough
CT: control target
= control target key end

     0   :  { %8 = vsyncpa [#allocation3], 0  ;;  %s745_s0 = inlined_call_operand.hbm [shape: f32[4,128], index: 0, kind: input, shape index: {}]   ;;  %s746_s1 = inlined_call_operand.vmem [shape: f32[1,128], index: 1, kind: input, shape index: {}]   ;;  %s747_s2 = inlined_call_operand.hbm [shape: f32[160,128], index: 2, kind: input, shape index: {}]   ;;  %s748_s3 = inlined_call_operand.hbm [shape: f32[8,128], index: 3, kind: output, shape index: {}]  }
   0x1   :  { %9 = vsyncpa [#allocation6], 0 }
   0x2   :  { %10 = vsyncpa [#allocation4], 0  ;;  %s653_s12 = smov [#allocation2]   ;;  %s654_s14 = smov [#allocation5]  }
   0x3   :  { %s17_s13 = sshll.u32 %s653_s12, 4  ;;  %s28_s15 = sshll.u32 %s654_s14, 4  ;;  %s18_s13 = int_to_ptr.vmem [resolvable:$true] %s17_s13  ;;  %s684_s15 = int_to_ptr.vmem [resolvable:$true] %s28_s15 }
   0x4   :  { %s581_s18 = scalar_lea.hbm %s745_s0, 64 }
   0x5   :  { %p582_p0 = scmp.ne.s32.totalorder %s745_s0, %s581_s18  ;;  %p585_p1 = scmp.lt.u32.totalorder %s581_s18, %s745_s0 }
   0x7   :  { %p587_p2 = pnand %p585_p1, %p582_p0 }
   0x9   :  { %590 = shalt.err (!%p587_p2)
}
   0xa   :  { %s591_s23 = scalar_lea.vmem %s18_s13, 64  ;;  %p596_p4 = scmp.lt.s32.totalorder %s18_s13, %s18_s13 }
   0xb   :  { %p592_p3 = scmp.ne.s32.totalorder %s18_s13, %s591_s23  ;;  %p597_p5 = scmp.lt.s32.totalorder %s591_s23, %s591_s23 }
   0xd   :  { %p598_p6 = por %p597_p5, %p596_p4 }
   0xf   :  { %p599_p7 = pnand %p598_p6, %p592_p3 }
  0x11   :  { %602 = shalt.err (!%p599_p7)
}
  0x12   :  { %20 = dma.hbm_to_vmem [thread:$0]  %s745_s0, 64, %s18_s13, [#allocation3]  }
  0x13   :  { %s603_s28 = scalar_lea.hbm %s747_s2, 2560 }
  0x14   :  { %p604_p8 = scmp.ne.s32.totalorder %s747_s2, %s603_s28  ;;  %p607_p9 = scmp.lt.u32.totalorder %s603_s28, %s747_s2 }
  0x16   :  { %p609_p10 = pnand %p607_p9, %p604_p8 }
  0x18   :  { %612 = shalt.err (!%p609_p10)
}
  0x19   :  { %s613_s6 = scalar_lea.vmem %s684_s15, 2560  ;;  %p618_p12 = scmp.lt.s32.totalorder %s684_s15, %s684_s15 }
  0x1a   :  { %p614_p11 = scmp.ne.s32.totalorder %s684_s15, %s613_s6  ;;  %p619_p13 = scmp.lt.s32.totalorder %s613_s6, %s613_s6 }
  0x1c   :  { %p620_p0 = por %p619_p13, %p618_p12 }
  0x1e   :  { %p621_p1 = pnand %p620_p0, %p614_p11 }
  0x20   :  { %624 = shalt.err (!%p621_p1)
}
  0x21   :  { %s655_s0 = smov 128   ;;  %s656_s7 = smov 8  }
  0x22   :  { %34 = dma.hbm_to_vmem [thread:$0]  %s747_s2, 2560, %s684_s15, [#allocation6], %s655_s0, %s655_s0, %s656_s7  }
  0x23   :  { %647 = dma.done.wait [#allocation3], 64  }
  0x24   :  { %648 = vsyncadd [#allocation3], 4294967232 }
  0x25   :  { %649 = dma.done.wait [#allocation6], 2560  }
  0x26   :  { %650 = vsyncadd [#allocation6], 4294964736  ;;  %v657_v0 = vmov 0   ;;  %vm96_vm0 = vcmask 1043456   ;;  %vm83_vm1 = vcmask 31744   ;;  %v43_v2 = vld [vmem:[#allocation5] sm:$0xff] }
  0x27   :  { %579 = vset.pattern.permute.xlu0 %v657_v0  ;;  %580 = vset.pattern.permute.xlu1 %v657_v0  ;;  %v41_v1 = vld [vmem:[#allocation2] sm:$0xf]  ;;  %v44_v3 = vld [vmem:[#allocation5 + $0x8] sm:$0xff]  ;;  %v45_v4 = vld [vmem:[#allocation5 + $0x10] sm:$0xff]  ;;  %s658_s11 = smov 1   ;;  %vm251_vm2 = vcmask 785408  }
  0x28   :  { %489 = vmatprep.subr.msk.mxu0 %vm96_vm0, %v41_v1  ;;  %491 = vmatprep.mubr.msk.f32.mxu0 %vm83_vm1, %v43_v2  ;;  %v52_v5 = vld [vmem:[#allocation5 + $0x48] sm:$0xff]  ;;  %v54_v6 = vld [vmem:[#allocation5 + $0x58] sm:$0xff]  ;;  %v53_v7 = vld [vmem:[#allocation5 + $0x50] sm:$0xff]  ;;  %v660_v0 = vmov 0.0|0.0   ;;  %vm661_vm3 = vmmov 0   ;;  %vm358_vm4 = vcmask 261120  }
  0x29   :  { %490 = vmatpush3.msk.msra.mxu0 %vm96_vm0, %v41_v1  ;;  %65 = vperm.xlu0 %579, %v52_v5   ;;  %v46_v8 = vld [vmem:[#allocation5 + $0x18] sm:$0xff]  ;;  %v55_v9 = vld [vmem:[#allocation5 + $0x60] sm:$0xff]  ;;  %v57_v33 = vld [vmem:[#allocation5 + $0x70] sm:$0xff]  ;;  %v662_v1 = vmov 0.0   ;;  %s663_s12 = smov [#allocation7]  }
  0x2a   :  { %492 = vmatmul.mubr.msk.f32.vlgmr.msra.gmra.mrb[0].mxu0 %vm83_vm1, %v44_v3  ;;  %75 = vperm.xlu1 %580, %v54_v6   ;;  %v722_v16 = vld [vmem:[%s746_s1] ss:$0 sm:$0xff]  ;;  %s659_s1 = smov 127   ;;  %v47_v34 = vld [vmem:[#allocation5 + $0x20] sm:$0xff]  ;;  %v56_v35 = vld [vmem:[#allocation5 + $0x68] sm:$0xff]  ;;  %s440_s13 = sshll.u32 %s663_s12, 4  ;;  %s441_s13 = int_to_ptr.vmem [resolvable:$true] %s440_s13 }
  0x2b   :  { %494 = vmatprep.mubr.msk.f32.mxu0 %vm83_vm1, %v45_v4  ;;  %521 = vmatprep.mubr.msk.f32.mxu1 %vm251_vm2, %v47_v34  ;;  %v59_v36 = vld [vmem:[#allocation5 + $0x80] sm:$0xff]  ;;  %v58_v37 = vld [vmem:[#allocation5 + $0x78] sm:$0xff]  ;;  %v60_v38 = vld [vmem:[#allocation5 + $0x88] sm:$0xff]  ;;  %s625_s14 = scalar_lea.vmem %s441_s13, 128  ;;  %p630_p3 = scmp.lt.s32.totalorder %s441_s13, %s441_s13 }
  0x2c   :  { %v456_v39 = vld [vmem:[#allocation5 + $0x90] ss:$0 sm:$0xff]  ;;  %v457_v52 = vld [vmem:[#allocation5 + $0x98] ss:$0 sm:$0xff]  ;;  %v48_v61 = vld [vmem:[#allocation5 + $0x28] sm:$0xff]  ;;  %562 = vmatprep.subr.bf16.mxu0 %v660_v0  ;;  %p626_p2 = scmp.ne.s32.totalorder %s441_s13, %s625_s14  ;;  %p631_p4 = scmp.lt.s32.totalorder %s625_s14, %s625_s14 }
  0x2d   :  { %70 = vperm.xlu0 %579, %v53_v7   ;;  %v49_v62 = vld [vmem:[#allocation5 + $0x30] sm:$0xff]  ;;  %v50_v63 = vld [vmem:[#allocation5 + $0x38] sm:$0xff] }
  0x2e   :  { %495 = vmatmul.mubr.msk.f32.gmra.mrb[2].mxu0 %vm83_vm1, %v46_v8  ;;  %80 = vperm.xlu1 %580, %v55_v9   ;;  %p632_p5 = por %p631_p4, %p630_p3 }
  0x2f   :  { %535 = vmatprep.mubr.msk.f32.mxu0 %vm661_vm3, %v662_v1 }
  0x30   :  { %p633_p6 = pnand %p632_p5, %p626_p2 }
  0xa8   :  { %v66_v10 = vpop.permute.xlu0 %65 }
  0xa9   :  { %v76_v11 = vpop.permute.xlu1 %75 }
  0xac   :  { %v71_v12 = vpop.permute.xlu0 %70 }
  0xad   :  { %v81_v19 = vpop.permute.xlu1 %80 }
  0xfd   :  { %v493_v13 = vpop.f32.mrb[0].mxu0 }
  0xfe   :  { %v172_v14 = vadd.f32 %v493_v13, %v71_v12  ;;  %v166_v15 = vpop.f32.mrb[1].mxu0 }
  0xff   :  { %v167_v17 = vadd.f32 %v166_v15, %v66_v10 }
 0x100   :  { %v186_v18 = vmax.f32 %v172_v14, 0.0 }
 0x101   :  { %v185_v20 = vmax.f32 %v167_v17, 0.0  ;;  %v496_v21 = vpop.f32.mrb[2].mxu0 }
 0x102   :  { %v196_v22 = vmul.f32 %v722_v16, %v186_v18  ;;  %v182_v23 = vadd.f32 %v496_v21, %v81_v19  ;;  %v176_v24 = vpop.f32.mrb[3].mxu0  ;;  %v51_v21 = vld [vmem:[#allocation5 + $0x40] sm:$0xff] }
 0x103   :  { %v195_v25 = vmul.f32 %v722_v16, %v185_v20  ;;  %v177_v26 = vadd.f32 %v176_v24, %v76_v11 }
 0x104   :  { %v188_v27 = vmax.f32 %v182_v23, 0.0  ;;  %201 = vrot.lane.b32.xlu1 %v196_v22, %s658_s11 }
 0x105   :  { %v187_v28 = vmax.f32 %v177_v26, 0.0  ;;  %199 = vrot.lane.b32.xlu0 %v195_v25, %s658_s11  ;;  %v546_v29 = vpack.c.bf16 %v196_v22, %v195_v25 }
 0x106   :  { %v198_v30 = vmul.f32 %v722_v16, %v188_v27 }
 0x107   :  { %v197_v31 = vmul.f32 %v722_v16, %v187_v28 }
 0x108   :  { %205 = vrot.lane.b32.xlu1 %v198_v30, %s658_s11 }
 0x109   :  { %203 = vrot.lane.b32.xlu0 %v197_v31, %s658_s11  ;;  %v550_v32 = vpack.c.bf16 %v198_v30, %v197_v31 }
 0x10c   :  { %217 = vrot.lane.b32.xlu1 %v196_v22, %s659_s1 }
 0x10d   :  { %215 = vrot.lane.b32.xlu0 %v195_v25, %s659_s1 }
 0x110   :  { %221 = vrot.lane.b32.xlu1 %v198_v30, %s659_s1 }
 0x111   :  { %219 = vrot.lane.b32.xlu0 %v197_v31, %s659_s1 }
 0x114   :  { %238 = vperm.xlu1 %580, %v57_v33  }
 0x115   :  { %233 = vperm.xlu0 %579, %v56_v35  }
 0x118   :  { %248 = vperm.xlu1 %580, %v59_v36  }
 0x119   :  { %243 = vperm.xlu0 %579, %v58_v37  }
 0x11d   :  { %355 = vperm.xlu0 %579, %v60_v38  }
 0x176   :  { %v202_v40 = vpop.permute.xlu1 %201 }
 0x177   :  { %v212_v41 = vmul.f32 %v456_v39, %v202_v40  ;;  %v200_v42 = vpop.permute.xlu0 %199 }
 0x178   :  { %v211_v43 = vmul.f32 %v456_v39, %v200_v42 }
 0x17a   :  { %v206_v44 = vpop.permute.xlu1 %205  ;;  %v538_v45 = vpack.c.bf16 %v212_v41, %v211_v43 }
 0x17b   :  { %v214_v46 = vmul.f32 %v456_v39, %v206_v44  ;;  %v204_v47 = vpop.permute.xlu0 %203 }
 0x17c   :  { %v213_v48 = vmul.f32 %v456_v39, %v204_v47  ;;  %539 = vmatprep.subr.bf16.mxu1 %v538_v45 }
 0x17d   :  { %541 = vmatpush3.bf16.msra.mxu1 %v538_v45 }
 0x17e   :  { %v542_v49 = vpack.c.bf16 %v214_v46, %v213_v48  ;;  %v218_v50 = vpop.permute.xlu1 %217 }
 0x17f   :  { %v216_v51 = vpop.permute.xlu0 %215  ;;  %v228_v53 = vmul.f32 %v457_v52, %v218_v50 }
 0x180   :  { %543 = vmatprep.subr.bf16.mxu1 %v542_v49  ;;  %v227_v54 = vmul.f32 %v457_v52, %v216_v51 }
 0x181   :  { %545 = vmatpush3.bf16.msra.mxu1 %v542_v49 }
 0x182   :  { %547 = vmatprep.subr.bf16.mxu1 %v546_v29  ;;  %v222_v55 = vpop.permute.xlu1 %221  ;;  %v554_v57 = vpack.c.bf16 %v228_v53, %v227_v54 }
 0x183   :  { %v220_v56 = vpop.permute.xlu0 %219  ;;  %v230_v58 = vmul.f32 %v457_v52, %v222_v55 }
 0x184   :  { %v229_v59 = vmul.f32 %v457_v52, %v220_v56 }
 0x185   :  { %549 = vmatpush3.bf16.msra.mxu1 %v546_v29 }
 0x186   :  { %551 = vmatprep.subr.bf16.mxu1 %v550_v32  ;;  %v558_v60 = vpack.c.bf16 %v230_v58, %v229_v59 }
 0x189   :  { %553 = vmatpush3.bf16.msra.mxu1 %v550_v32 }
 0x18a   :  { %555 = vmatprep.subr.bf16.mxu1 %v554_v57 }
 0x18d   :  { %557 = vmatpush3.bf16.msra.mxu1 %v554_v57 }
 0x18e   :  { %559 = vmatprep.subr.bf16.mxu1 %v558_v60 }
 0x191   :  { %561 = vmatpush3.bf16.msra.mxu1 %v558_v60 }
 0x193   :  { %v239_v2 = vpop.permute.xlu1 %238 }
 0x194   :  { %522 = vmatmul.mubr.msk.f32.vlgmr.msra.gmra.mrb[0].mxu1 %vm251_vm2, %v48_v61  ;;  %v234_v3 = vpop.permute.xlu0 %233 }
 0x195   :  { %524 = vmatprep.mubr.msk.f32.mxu1 %vm251_vm2, %v49_v62 }
 0x197   :  { %v249_v9 = vpop.permute.xlu1 %248 }
 0x198   :  { %525 = vmatmul.mubr.msk.f32.gmra.mrb[2].mxu1 %vm251_vm2, %v50_v63  ;;  %v244_v12 = vpop.permute.xlu0 %243 }
 0x19c   :  { %v356_v22 = vpop.permute.xlu0 %355 }
 0x267   :  { %v523_v4 = vpop.f32.mrb[0].mxu1 }
 0x268   :  { %v336_v5 = vadd.f32 %v523_v4, %v239_v2  ;;  %v330_v6 = vpop.f32.mrb[1].mxu1 }
 0x269   :  { %v331_v7 = vadd.f32 %v330_v6, %v234_v3 }
 0x26a   :  { %v350_v8 = vmax.f32 %v336_v5, 0.0 }
 0x26b   :  { %v349_v10 = vmax.f32 %v331_v7, 0.0  ;;  %v526_v11 = vpop.f32.mrb[2].mxu1 }
 0x26c   :  { %v346_v13 = vadd.f32 %v526_v11, %v249_v9  ;;  %v340_v14 = vpop.f32.mrb[3].mxu1 }
 0x26d   :  { %v563_v15 = vpack.c.bf16 %v350_v8, %v349_v10  ;;  %v341_v17 = vadd.f32 %v340_v14, %v244_v12 }
 0x26e   :  { %v352_v18 = vmax.f32 %v346_v13, 0.0 }
 0x26f   :  { %v351_v19 = vmax.f32 %v341_v17, 0.0  ;;  %564 = vmatpush3.bf16.msra.mxu0 %v563_v15 }
 0x270   :  { %565 = vmatprep.subr.bf16.mxu0 %v660_v0 }
 0x271   :  { %v566_v20 = vpack.c.bf16 %v352_v18, %v351_v19 }
 0x273   :  { %567 = vmatpush3.bf16.msra.mxu0 %v566_v20 }
 0x276   :  { %536 = vmatmul.mubr.msk.f32.vlgmr.msra.gmra.mrb[4].mxu0 %vm358_vm4, %v51_v21 }
 0x349   :  { %v428_v23 = vpop.f32.mrb[4].mxu0 }
 0x34a   :  { %v429_v24 = vadd.f32 %v428_v23, %v356_v22  ;;  %v537_v25 = vpop.f32.mrb[5].mxu0 }
 0x34c   :  { %v432_v26 = vmul.f32 %v722_v16, %v429_v24 }
 0x34e   :  { %433 = vst [vmem:[#allocation7] sm:$0xff] %v432_v26 }
 0x34f   :  { %636 = shalt.err (!%p633_p6)
}
 0x350   :  { %s637_s17 = scalar_lea.hbm %s748_s3, 128 }
 0x351   :  { %p638_p7 = scmp.ne.s32.totalorder %s748_s3, %s637_s17  ;;  %p641_p8 = scmp.lt.u32.totalorder %s637_s17, %s748_s3 }
 0x353   :  { %p643_p9 = pnand %p641_p8, %p638_p7 }
 0x355   :  { %646 = shalt.err (!%p643_p9)
}
 0x356   :  { %443 = dma.vmem_to_hbm [thread:$0]  %s441_s13, 128, %s748_s3, [#allocation4]  }
 0x357   :  { %651 = dma.done.wait [#allocation4], 128  }
 0x358   :  { %652 = vsyncadd [#allocation4], 4294967168 }
 0x359   :  { %447 = vsyncpa [#allocation3], 1 }
 0x35a   :  { %448 = vsyncpa [#allocation6], 1 }
 0x35b   :  { %449 = vsyncpa [#allocation4], 1 }

</bundles_post_ra>
